<compile_context>
chip_gen: v7x
topology: tpu7x:2x2x1
jax: 0.10.0
libtpu: 0.0.40
codegen_flags: <defaults>
</compile_context>

<pallas_src>
import functools

import jax
import jax.numpy as jnp
import numpy as np
from jax.experimental import pallas as pl
from jax.experimental.pallas import tpu as pltpu


def _convblock_kernel(x_ref, w1_ref, w2_ref, w3_ref, bias_ref, mask_ref, out_ref,
                      *, W, HW_pad, R_in, R_mid, R_out, ksize, residual,
                      mask_all_ones, fma_max_rows):
    p = ksize // 2
    x = x_ref[0]                                   # (R_in, HW_pad) lane-dense

    # Packed BN shifts (already folded with conv bias) as (R, 1) columns.
    b1 = bias_ref[:R_mid, 0:1]
    b2 = bias_ref[:R_mid, 1:2]
    b3 = bias_ref[:R_out, 2:3]

    def mm(w_ref, v, n_in):
        # 1x1 conv over (packed) channel rows.  Tiny row counts -> unrolled VPU
        # FMAs on full-sublane tiles; larger -> MXU with bf16 operands and f32
        # accumulation (MXU is bf16-native on v6e/v7x).
        if n_in <= fma_max_rows:
            w = w_ref[...]
            acc = w[:, 0:1] * v[0:1, :]
            for ci in range(1, n_in):
                acc = acc + w[:, ci:ci + 1] * v[ci:ci + 1, :]
            return acc
        return jnp.dot(w_ref[...].astype(jnp.bfloat16), v.astype(jnp.bfloat16),
                       preferred_element_type=jnp.float32)

    # ---- conv1 (1x1, BN folded) + ReLU ----
    h1 = jnp.maximum(mm(w1_ref, x, R_in) + b1, 0.0)            # (R_mid, HW_pad)

    # ---- conv2: depthwise ksize x ksize, stride 1, zero padding (BN folded) ----
    # Taps are lane rotations (XLU) of the in-register h1; precomputed per-tap
    # row/col validity masks implement the zero padding.  No VMEM scratch.
    w2 = w2_ref[...]                                           # (R_mid, k*k)
    h2 = None
    for dj in range(ksize):
        for di in range(ksize):
            off = (di - p) * W + (dj - p)
            idx = di * ksize + dj
            tap = h1 if off == 0 else pltpu.roll(h1, shift=(-off) % HW_pad, axis=1)
            t = tap * w2[:, idx:idx + 1]
            if not mask_all_ones[idx]:                         # static skip of all-ones masks
                t = t * mask_ref[idx:idx + 1, :]
            h2 = t if h2 is None else h2 + t
    h2 = jnp.maximum(h2 + b2, 0.0)                             # (R_mid, HW_pad)

    # ---- conv3 (1x1, BN folded) + residual ----
    h3 = mm(w3_ref, h2, R_mid) + b3                            # (R_out, HW_pad)
    if residual:
        h3 = h3 + x
    out_ref[0] = h3                                            # full-lane store


def conv_block_forward(x_nchw, w1, w2dw, w3, bn1, bn2, bn3, *, ksize=3, eps=1e-5,
                       stride=1, groups=1):
    """Fused ConvBlock forward (inference), PyTorch NCHW in / NCHW out.

    x_nchw : (N, C_in, H, W) f32
    w1     : (C_mid, C_in)          conv1 1x1 weight
    w2dw   : (C_mid, ksize, ksize)  conv2 depthwise weight
    w3     : (C_out, C_mid)         conv3 1x1 weight
    bn*    : (gamma, beta, running_mean, running_var), each (C,)
    """
    assert stride == 1 and groups == 1  # TODO(synk): stride=2 / ChannelShuffle paths
    N, C_in, H, W = x_nchw.shape
    C_mid = w1.shape[0]
    C_out = w3.shape[0]
    HW = H * W
    HW_pad = int(pl.cdiv(HW, 128)) * 128           # lane-dense layout for any H, W
    residual = (C_in == C_out) and (stride == 1)
    p = ksize // 2

    # ---- images packed per grid step: fill the 8 vreg sublanes ----
    # (On v7x one may prefer keeping >=2 grid steps so both TensorCores get
    #  work; at demo scale full sublane packing + fewer steps wins.)
    target = max(1, 8 // max(C_in, C_mid, C_out))
    G = 1
    for g in range(min(target, N), 0, -1):
        if N % g == 0:
            G = g
            break
    R_in, R_mid, R_out = G * C_in, G * C_mid, G * C_out

    # ---- fold BatchNorm (inference affine) into conv weights / biases ----
    def fold(gam, bet, m, v):
        s = gam / jnp.sqrt(v + eps)
        return s, bet - m * s

    s1, t1 = fold(*bn1)
    s2, t2 = fold(*bn2)
    s3, t3 = fold(*bn3)
    w1f = (w1 * s1[:, None]).astype(jnp.float32)                             # (C_mid, C_in)
    w2f = (w2dw * s2[:, None, None]).reshape(C_mid, ksize * ksize).astype(jnp.float32)
    w3f = (w3 * s3[:, None]).astype(jnp.float32)                             # (C_out, C_mid)

    # Block-diagonal (per packed image) 1x1 weights; tiled depthwise weights.
    eye = jnp.eye(G, dtype=jnp.float32)
    w1_bd = jnp.kron(eye, w1f)                      # (R_mid, R_in)
    w3_bd = jnp.kron(eye, w3f)                      # (R_out, R_mid)
    w2_t = jnp.tile(w2f, (G, 1))                    # (R_mid, k*k)

    Cmax = max(C_mid, C_out)
    bias = jnp.zeros((G * Cmax, 3), jnp.float32)
    bias = bias.at[:R_mid, 0].set(jnp.tile(t1, (G,)))
    bias = bias.at[:R_mid, 1].set(jnp.tile(t2, (G,)))
    bias = bias.at[:R_out, 2].set(jnp.tile(t3, (G,)))

    # Precomputed per-tap zero-padding validity masks (grid/loop invariant).
    masks_np = np.zeros((ksize * ksize, HW_pad), np.float32)
    ys, xs = np.divmod(np.arange(HW), W)
    for di in range(ksize):
        for dj in range(ksize):
            yy = ys + di - p
            xx = xs + dj - p
            valid = (yy >= 0) & (yy < H) & (xx >= 0) & (xx < W)
            masks_np[di * ksize + dj, :HW] = valid.astype(np.float32)
    mask_all_ones = tuple(bool(np.all(masks_np[i] == 1.0))
                          for i in range(ksize * ksize))
    masks = jnp.asarray(masks_np)

    # Lane-dense presentation: (N/G, G*C, HW_pad); contiguous reshapes only,
    # no NCHW<->NHWC transpose.
    x_flat = x_nchw.reshape(N, C_in, HW)
    if HW_pad != HW:
        x_flat = jnp.pad(x_flat, ((0, 0), (0, 0), (0, HW_pad - HW)))
    x_pack = x_flat.reshape(N // G, R_in, HW_pad)

    kern = functools.partial(
        _convblock_kernel, W=W, HW_pad=HW_pad, R_in=R_in, R_mid=R_mid,
        R_out=R_out, ksize=ksize, residual=residual,
        mask_all_ones=mask_all_ones, fma_max_rows=8)

    # Explicit VMEM budget: double-buffered x/out tiles + weights/masks + slack.
    fb = 4  # f32 bytes
    vmem_est = fb * (2 * R_in * HW_pad + 2 * R_out * HW_pad
                     + R_mid * R_in + R_mid * ksize * ksize + R_out * R_mid
                     + 3 * G * Cmax + ksize * ksize * HW_pad
                     + 4 * R_mid * HW_pad)
    vmem_limit = int(min(max(vmem_est + (4 << 20), 32 << 20), 60 << 20))

    out = pl.pallas_call(
        kern,
        out_shape=jax.ShapeDtypeStruct((N // G, R_out, HW_pad), jnp.float32),
        grid=(N // G,),
        in_specs=[
            pl.BlockSpec((1, R_in, HW_pad), lambda b: (b, 0, 0)),       # x (lane-dense, packed)
            pl.BlockSpec((R_mid, R_in), lambda b: (0, 0)),              # w1 block-diag, BN folded
            pl.BlockSpec((R_mid, ksize * ksize), lambda b: (0, 0)),     # w2 depthwise, BN folded
            pl.BlockSpec((R_out, R_mid), lambda b: (0, 0)),             # w3 block-diag, BN folded
            pl.BlockSpec((G * Cmax, 3), lambda b: (0, 0)),              # packed BN shifts
            pl.BlockSpec((ksize * ksize, HW_pad), lambda b: (0, 0)),    # tap validity masks
        ],
        out_specs=pl.BlockSpec((1, R_out, HW_pad), lambda b: (b, 0, 0)),
        compiler_params=pltpu.CompilerParams(
            dimension_semantics=("parallel",),
            vmem_limit_bytes=vmem_limit),
    )(x_pack, w1_bd, w2_t, w3_bd, bias, masks)

    out = out.reshape(N, C_out, HW_pad)[:, :, :HW].reshape(N, C_out, H, W)
    return out


def _ref_forward(x, w1, w2dw, w3, bn1, bn2, bn3, ksize=3, eps=1e-5):
    """Pure-JAX reference of the original (un-folded) module forward, NCHW."""
    N, C_in, H, W = x.shape
    p = ksize // 2

    def bn(h, params):
        g, b, m, v = params
        s = g / jnp.sqrt(v + eps)
        return h * s[None, :, None, None] + (b - m * s)[None, :, None, None]

    h = jnp.einsum('nchw,dc->ndhw', x, w1)
    h = jnp.maximum(bn(h, bn1), 0.0)
    hp = jnp.pad(h, ((0, 0), (0, 0), (p, p), (p, p)))
    acc = 0.0
    for di in range(ksize):
        for dj in range(ksize):
            acc = acc + hp[:, :, di:di + H, dj:dj + W] * w2dw[:, di, dj][None, :, None, None]
    h = jnp.maximum(bn(acc, bn2), 0.0)
    h = jnp.einsum('nchw,dc->ndhw', h, w3)
    h = bn(h, bn3)
    if C_in == w3.shape[0]:
        h = h + x
    return h


if __name__ == "__main__":
    # ConvBlock defaults: expansion=1, kernel_size=3, stride=1, groups=1.
    N, C_in, H, W = 2, 4, 16, 16
    expansion, ksize, eps = 1, 3, 1e-5
    C_mid = C_in * expansion
    C_out = 4

    key = jax.random.PRNGKey(0)
    ks = jax.random.split(key, 16)

    x = jax.random.normal(ks[0], (N, C_in, H, W), jnp.float32)

    # Conv weights (PyTorch shapes with trivial 1x1 / depth-multiplier dims folded):
    # conv1 (C_mid,C_in,1,1) -> (C_mid,C_in); conv2 (C_mid,1,k,k) -> (C_mid,k,k);
    # conv3 (C_out,C_mid,1,1) -> (C_out,C_mid).
    w1 = 0.1 * jax.random.normal(ks[1], (C_mid, C_in), jnp.float32)
    w2 = 0.1 * jax.random.normal(ks[2], (C_mid, ksize, ksize), jnp.float32)
    w3 = 0.1 * jax.random.normal(ks[3], (C_out, C_mid), jnp.float32)

    def bn_params(kg, kb, km, kv, c):
        gamma = 0.5 + jax.random.uniform(kg, (c,), jnp.float32)
        beta = 0.1 * jax.random.normal(kb, (c,), jnp.float32)
        mean = 0.2 * jax.random.normal(km, (c,), jnp.float32)
        var = 0.5 + jax.random.uniform(kv, (c,), jnp.float32)
        return gamma, beta, mean, var

    bn1 = bn_params(ks[4], ks[5], ks[6], ks[7], C_mid)
    bn2 = bn_params(ks[8], ks[9], ks[10], ks[11], C_mid)
    bn3 = bn_params(ks[12], ks[13], ks[14], ks[15], C_out)

    out = conv_block_forward(x, w1, w2, w3, bn1, bn2, bn3, ksize=ksize, eps=eps)
    out = jax.block_until_ready(out)

    ref = _ref_forward(x, w1, w2, w3, bn1, bn2, bn3, ksize=ksize, eps=eps)
    np.testing.assert_allclose(np.asarray(out), np.asarray(ref), rtol=1e-4, atol=1e-5)

    print("KERNEL_OK")
</pallas_src>

<mosaic_0001>
module attributes {stable_mosaic.version = 11 : i64} {
  func.func @_convblock_kernel(%arg0: i32, %arg1: memref<1x8x256xf32, #tpu.memory_space<vmem>>, %arg2: memref<8x8xf32, #tpu.memory_space<vmem>>, %arg3: memref<8x9xf32, #tpu.memory_space<vmem>>, %arg4: memref<8x8xf32, #tpu.memory_space<vmem>>, %arg5: memref<8x3xf32, #tpu.memory_space<vmem>>, %arg6: memref<9x256xf32, #tpu.memory_space<vmem>>, %arg7: memref<1x8x256xf32, #tpu.memory_space<vmem>>) attributes {dimension_semantics = [#tpu.dimension_semantics<parallel>], iteration_bounds = array<i64: 1>, scalar_prefetch = 0 : i64, scratch_operands = 0 : i64, tpu.core_type = #tpu.core_type<tc>, window_params = [{transform_indices = @transform_0, window_bounds = array<i64: 1, 8, 256>}, {pipeline_mode = #tpu.pipeline_mode<synchronous>, transform_indices = @transform_1, window_bounds = array<i64: 8, 8>}, {pipeline_mode = #tpu.pipeline_mode<synchronous>, transform_indices = @transform_2, window_bounds = array<i64: 8, 9>}, {pipeline_mode = #tpu.pipeline_mode<synchronous>, transform_indices = @transform_3, window_bounds = array<i64: 8, 8>}, {pipeline_mode = #tpu.pipeline_mode<synchronous>, transform_indices = @transform_4, window_bounds = array<i64: 8, 3>}, {pipeline_mode = #tpu.pipeline_mode<synchronous>, transform_indices = @transform_5, window_bounds = array<i64: 9, 256>}, {transform_indices = @transform_6, window_bounds = array<i64: 1, 8, 256>}]} {
    %c0 = arith.constant 0 : index
    %c0_0 = arith.constant 0 : index
    %c0_1 = arith.constant 0 : index
    %0 = vector.load %arg1[%c0, %c0_0, %c0_1] : memref<1x8x256xf32, #tpu.memory_space<vmem>>, vector<1x8x256xf32>
    %1 = vector.shape_cast %0 : vector<1x8x256xf32> to vector<8x256xf32>
    %c0_2 = arith.constant 0 : index
    %c0_3 = arith.constant 0 : index
    %2 = vector.load %arg5[%c0_2, %c0_3] : memref<8x3xf32, #tpu.memory_space<vmem>>, vector<8x1xf32>
    %c0_4 = arith.constant 0 : index
    %c1 = arith.constant 1 : index
    %3 = vector.load %arg5[%c0_4, %c1] : memref<8x3xf32, #tpu.memory_space<vmem>>, vector<8x1xf32>
    %c0_5 = arith.constant 0 : index
    %c2 = arith.constant 2 : index
    %4 = vector.load %arg5[%c0_5, %c2] : memref<8x3xf32, #tpu.memory_space<vmem>>, vector<8x1xf32>
    %c0_6 = arith.constant 0 : index
    %c0_7 = arith.constant 0 : index
    %5 = vector.load %arg2[%c0_6, %c0_7] : memref<8x8xf32, #tpu.memory_space<vmem>>, vector<8x8xf32>
    %6 = vector.extract_strided_slice %5 {offsets = [0, 0], sizes = [8, 1], strides = [1, 1]} : vector<8x8xf32> to vector<8x1xf32>
    %7 = vector.extract_strided_slice %1 {offsets = [0, 0], sizes = [1, 256], strides = [1, 1]} : vector<8x256xf32> to vector<1x256xf32>
    %8 = vector.broadcast %6 : vector<8x1xf32> to vector<8x256xf32>
    %9 = vector.broadcast %7 : vector<1x256xf32> to vector<8x256xf32>
    %10 = arith.mulf %8, %9 : vector<8x256xf32>
    %11 = vector.extract_strided_slice %5 {offsets = [0, 1], sizes = [8, 1], strides = [1, 1]} : vector<8x8xf32> to vector<8x1xf32>
    %12 = vector.extract_strided_slice %1 {offsets = [1, 0], sizes = [1, 256], strides = [1, 1]} : vector<8x256xf32> to vector<1x256xf32>
    %13 = vector.broadcast %11 : vector<8x1xf32> to vector<8x256xf32>
    %14 = vector.broadcast %12 : vector<1x256xf32> to vector<8x256xf32>
    %15 = arith.mulf %13, %14 : vector<8x256xf32>
    %16 = arith.addf %10, %15 : vector<8x256xf32>
    %17 = vector.extract_strided_slice %5 {offsets = [0, 2], sizes = [8, 1], strides = [1, 1]} : vector<8x8xf32> to vector<8x1xf32>
    %18 = vector.extract_strided_slice %1 {offsets = [2, 0], sizes = [1, 256], strides = [1, 1]} : vector<8x256xf32> to vector<1x256xf32>
    %19 = vector.broadcast %17 : vector<8x1xf32> to vector<8x256xf32>
    %20 = vector.broadcast %18 : vector<1x256xf32> to vector<8x256xf32>
    %21 = arith.mulf %19, %20 : vector<8x256xf32>
    %22 = arith.addf %16, %21 : vector<8x256xf32>
    %23 = vector.extract_strided_slice %5 {offsets = [0, 3], sizes = [8, 1], strides = [1, 1]} : vector<8x8xf32> to vector<8x1xf32>
    %24 = vector.extract_strided_slice %1 {offsets = [3, 0], sizes = [1, 256], strides = [1, 1]} : vector<8x256xf32> to vector<1x256xf32>
    %25 = vector.broadcast %23 : vector<8x1xf32> to vector<8x256xf32>
    %26 = vector.broadcast %24 : vector<1x256xf32> to vector<8x256xf32>
    %27 = arith.mulf %25, %26 : vector<8x256xf32>
    %28 = arith.addf %22, %27 : vector<8x256xf32>
    %29 = vector.extract_strided_slice %5 {offsets = [0, 4], sizes = [8, 1], strides = [1, 1]} : vector<8x8xf32> to vector<8x1xf32>
    %30 = vector.extract_strided_slice %1 {offsets = [4, 0], sizes = [1, 256], strides = [1, 1]} : vector<8x256xf32> to vector<1x256xf32>
    %31 = vector.broadcast %29 : vector<8x1xf32> to vector<8x256xf32>
    %32 = vector.broadcast %30 : vector<1x256xf32> to vector<8x256xf32>
    %33 = arith.mulf %31, %32 : vector<8x256xf32>
    %34 = arith.addf %28, %33 : vector<8x256xf32>
    %35 = vector.extract_strided_slice %5 {offsets = [0, 5], sizes = [8, 1], strides = [1, 1]} : vector<8x8xf32> to vector<8x1xf32>
    %36 = vector.extract_strided_slice %1 {offsets = [5, 0], sizes = [1, 256], strides = [1, 1]} : vector<8x256xf32> to vector<1x256xf32>
    %37 = vector.broadcast %35 : vector<8x1xf32> to vector<8x256xf32>
    %38 = vector.broadcast %36 : vector<1x256xf32> to vector<8x256xf32>
    %39 = arith.mulf %37, %38 : vector<8x256xf32>
    %40 = arith.addf %34, %39 : vector<8x256xf32>
    %41 = vector.extract_strided_slice %5 {offsets = [0, 6], sizes = [8, 1], strides = [1, 1]} : vector<8x8xf32> to vector<8x1xf32>
    %42 = vector.extract_strided_slice %1 {offsets = [6, 0], sizes = [1, 256], strides = [1, 1]} : vector<8x256xf32> to vector<1x256xf32>
    %43 = vector.broadcast %41 : vector<8x1xf32> to vector<8x256xf32>
    %44 = vector.broadcast %42 : vector<1x256xf32> to vector<8x256xf32>
    %45 = arith.mulf %43, %44 : vector<8x256xf32>
    %46 = arith.addf %40, %45 : vector<8x256xf32>
    %47 = vector.extract_strided_slice %5 {offsets = [0, 7], sizes = [8, 1], strides = [1, 1]} : vector<8x8xf32> to vector<8x1xf32>
    %48 = vector.extract_strided_slice %1 {offsets = [7, 0], sizes = [1, 256], strides = [1, 1]} : vector<8x256xf32> to vector<1x256xf32>
    %49 = vector.broadcast %47 : vector<8x1xf32> to vector<8x256xf32>
    %50 = vector.broadcast %48 : vector<1x256xf32> to vector<8x256xf32>
    %51 = arith.mulf %49, %50 : vector<8x256xf32>
    %52 = arith.addf %46, %51 : vector<8x256xf32>
    %53 = vector.broadcast %2 : vector<8x1xf32> to vector<8x256xf32>
    %54 = arith.addf %52, %53 : vector<8x256xf32>
    %cst = arith.constant 0.000000e+00 : f32
    %55 = vector.broadcast %cst : f32 to vector<8x256xf32>
    %56 = arith.maximumf %54, %55 : vector<8x256xf32>
    %c0_8 = arith.constant 0 : index
    %c0_9 = arith.constant 0 : index
    %57 = vector.load %arg3[%c0_8, %c0_9] : memref<8x9xf32, #tpu.memory_space<vmem>>, vector<8x9xf32>
    %c17_i32 = arith.constant 17 : i32
    %58 = tpu.dynamic_rotate %56 by %c17_i32 dim 1 : vector<8x256xf32>, i32 -> vector<8x256xf32>
    %59 = vector.extract_strided_slice %57 {offsets = [0, 0], sizes = [8, 1], strides = [1, 1]} : vector<8x9xf32> to vector<8x1xf32>
    %60 = vector.broadcast %59 : vector<8x1xf32> to vector<8x256xf32>
    %61 = arith.mulf %58, %60 : vector<8x256xf32>
    %c0_10 = arith.constant 0 : index
    %c0_11 = arith.constant 0 : index
    %62 = vector.load %arg6[%c0_10, %c0_11] : memref<9x256xf32, #tpu.memory_space<vmem>>, vector<1x256xf32>
    %63 = vector.broadcast %62 : vector<1x256xf32> to vector<8x256xf32>
    %64 = arith.mulf %61, %63 : vector<8x256xf32>
    %c1_i32 = arith.constant 1 : i32
    %65 = tpu.dynamic_rotate %56 by %c1_i32 dim 1 : vector<8x256xf32>, i32 -> vector<8x256xf32>
    %66 = vector.extract_strided_slice %57 {offsets = [0, 3], sizes = [8, 1], strides = [1, 1]} : vector<8x9xf32> to vector<8x1xf32>
    %67 = vector.broadcast %66 : vector<8x1xf32> to vector<8x256xf32>
    %68 = arith.mulf %65, %67 : vector<8x256xf32>
    %c3 = arith.constant 3 : index
    %c0_12 = arith.constant 0 : index
    %69 = vector.load %arg6[%c3, %c0_12] : memref<9x256xf32, #tpu.memory_space<vmem>>, vector<1x256xf32>
    %70 = vector.broadcast %69 : vector<1x256xf32> to vector<8x256xf32>
    %71 = arith.mulf %68, %70 : vector<8x256xf32>
    %72 = arith.addf %64, %71 : vector<8x256xf32>
    %c241_i32 = arith.constant 241 : i32
    %73 = tpu.dynamic_rotate %56 by %c241_i32 dim 1 : vector<8x256xf32>, i32 -> vector<8x256xf32>
    %74 = vector.extract_strided_slice %57 {offsets = [0, 6], sizes = [8, 1], strides = [1, 1]} : vector<8x9xf32> to vector<8x1xf32>
    %75 = vector.broadcast %74 : vector<8x1xf32> to vector<8x256xf32>
    %76 = arith.mulf %73, %75 : vector<8x256xf32>
    %c6 = arith.constant 6 : index
    %c0_13 = arith.constant 0 : index
    %77 = vector.load %arg6[%c6, %c0_13] : memref<9x256xf32, #tpu.memory_space<vmem>>, vector<1x256xf32>
    %78 = vector.broadcast %77 : vector<1x256xf32> to vector<8x256xf32>
    %79 = arith.mulf %76, %78 : vector<8x256xf32>
    %80 = arith.addf %72, %79 : vector<8x256xf32>
    %c16_i32 = arith.constant 16 : i32
    %81 = tpu.dynamic_rotate %56 by %c16_i32 dim 1 : vector<8x256xf32>, i32 -> vector<8x256xf32>
    %82 = vector.extract_strided_slice %57 {offsets = [0, 1], sizes = [8, 1], strides = [1, 1]} : vector<8x9xf32> to vector<8x1xf32>
    %83 = vector.broadcast %82 : vector<8x1xf32> to vector<8x256xf32>
    %84 = arith.mulf %81, %83 : vector<8x256xf32>
    %c1_14 = arith.constant 1 : index
    %c0_15 = arith.constant 0 : index
    %85 = vector.load %arg6[%c1_14, %c0_15] : memref<9x256xf32, #tpu.memory_space<vmem>>, vector<1x256xf32>
    %86 = vector.broadcast %85 : vector<1x256xf32> to vector<8x256xf32>
    %87 = arith.mulf %84, %86 : vector<8x256xf32>
    %88 = arith.addf %80, %87 : vector<8x256xf32>
    %89 = vector.extract_strided_slice %57 {offsets = [0, 4], sizes = [8, 1], strides = [1, 1]} : vector<8x9xf32> to vector<8x1xf32>
    %90 = vector.broadcast %89 : vector<8x1xf32> to vector<8x256xf32>
    %91 = arith.mulf %56, %90 : vector<8x256xf32>
    %92 = arith.addf %88, %91 : vector<8x256xf32>
    %c240_i32 = arith.constant 240 : i32
    %93 = tpu.dynamic_rotate %56 by %c240_i32 dim 1 : vector<8x256xf32>, i32 -> vector<8x256xf32>
    %94 = vector.extract_strided_slice %57 {offsets = [0, 7], sizes = [8, 1], strides = [1, 1]} : vector<8x9xf32> to vector<8x1xf32>
    %95 = vector.broadcast %94 : vector<8x1xf32> to vector<8x256xf32>
    %96 = arith.mulf %93, %95 : vector<8x256xf32>
    %c7 = arith.constant 7 : index
    %c0_16 = arith.constant 0 : index
    %97 = vector.load %arg6[%c7, %c0_16] : memref<9x256xf32, #tpu.memory_space<vmem>>, vector<1x256xf32>
    %98 = vector.broadcast %97 : vector<1x256xf32> to vector<8x256xf32>
    %99 = arith.mulf %96, %98 : vector<8x256xf32>
    %100 = arith.addf %92, %99 : vector<8x256xf32>
    %c15_i32 = arith.constant 15 : i32
    %101 = tpu.dynamic_rotate %56 by %c15_i32 dim 1 : vector<8x256xf32>, i32 -> vector<8x256xf32>
    %102 = vector.extract_strided_slice %57 {offsets = [0, 2], sizes = [8, 1], strides = [1, 1]} : vector<8x9xf32> to vector<8x1xf32>
    %103 = vector.broadcast %102 : vector<8x1xf32> to vector<8x256xf32>
    %104 = arith.mulf %101, %103 : vector<8x256xf32>
    %c2_17 = arith.constant 2 : index
    %c0_18 = arith.constant 0 : index
    %105 = vector.load %arg6[%c2_17, %c0_18] : memref<9x256xf32, #tpu.memory_space<vmem>>, vector<1x256xf32>
    %106 = vector.broadcast %105 : vector<1x256xf32> to vector<8x256xf32>
    %107 = arith.mulf %104, %106 : vector<8x256xf32>
    %108 = arith.addf %100, %107 : vector<8x256xf32>
    %c255_i32 = arith.constant 255 : i32
    %109 = tpu.dynamic_rotate %56 by %c255_i32 dim 1 : vector<8x256xf32>, i32 -> vector<8x256xf32>
    %110 = vector.extract_strided_slice %57 {offsets = [0, 5], sizes = [8, 1], strides = [1, 1]} : vector<8x9xf32> to vector<8x1xf32>
    %111 = vector.broadcast %110 : vector<8x1xf32> to vector<8x256xf32>
    %112 = arith.mulf %109, %111 : vector<8x256xf32>
    %c5 = arith.constant 5 : index
    %c0_19 = arith.constant 0 : index
    %113 = vector.load %arg6[%c5, %c0_19] : memref<9x256xf32, #tpu.memory_space<vmem>>, vector<1x256xf32>
    %114 = vector.broadcast %113 : vector<1x256xf32> to vector<8x256xf32>
    %115 = arith.mulf %112, %114 : vector<8x256xf32>
    %116 = arith.addf %108, %115 : vector<8x256xf32>
    %c239_i32 = arith.constant 239 : i32
    %117 = tpu.dynamic_rotate %56 by %c239_i32 dim 1 : vector<8x256xf32>, i32 -> vector<8x256xf32>
    %118 = vector.extract_strided_slice %57 {offsets = [0, 8], sizes = [8, 1], strides = [1, 1]} : vector<8x9xf32> to vector<8x1xf32>
    %119 = vector.broadcast %118 : vector<8x1xf32> to vector<8x256xf32>
    %120 = arith.mulf %117, %119 : vector<8x256xf32>
    %c8 = arith.constant 8 : index
    %c0_20 = arith.constant 0 : index
    %121 = vector.load %arg6[%c8, %c0_20] : memref<9x256xf32, #tpu.memory_space<vmem>>, vector<1x256xf32>
    %122 = vector.broadcast %121 : vector<1x256xf32> to vector<8x256xf32>
    %123 = arith.mulf %120, %122 : vector<8x256xf32>
    %124 = arith.addf %116, %123 : vector<8x256xf32>
    %125 = vector.broadcast %3 : vector<8x1xf32> to vector<8x256xf32>
    %126 = arith.addf %124, %125 : vector<8x256xf32>
    %cst_21 = arith.constant 0.000000e+00 : f32
    %127 = vector.broadcast %cst_21 : f32 to vector<8x256xf32>
    %128 = arith.maximumf %126, %127 : vector<8x256xf32>
    %c0_22 = arith.constant 0 : index
    %c0_23 = arith.constant 0 : index
    %129 = vector.load %arg4[%c0_22, %c0_23] : memref<8x8xf32, #tpu.memory_space<vmem>>, vector<8x8xf32>
    %130 = vector.extract_strided_slice %129 {offsets = [0, 0], sizes = [8, 1], strides = [1, 1]} : vector<8x8xf32> to vector<8x1xf32>
    %131 = vector.extract_strided_slice %128 {offsets = [0, 0], sizes = [1, 256], strides = [1, 1]} : vector<8x256xf32> to vector<1x256xf32>
    %132 = vector.broadcast %130 : vector<8x1xf32> to vector<8x256xf32>
    %133 = vector.broadcast %131 : vector<1x256xf32> to vector<8x256xf32>
    %134 = arith.mulf %132, %133 : vector<8x256xf32>
    %135 = vector.extract_strided_slice %129 {offsets = [0, 1], sizes = [8, 1], strides = [1, 1]} : vector<8x8xf32> to vector<8x1xf32>
    %136 = vector.extract_strided_slice %128 {offsets = [1, 0], sizes = [1, 256], strides = [1, 1]} : vector<8x256xf32> to vector<1x256xf32>
    %137 = vector.broadcast %135 : vector<8x1xf32> to vector<8x256xf32>
    %138 = vector.broadcast %136 : vector<1x256xf32> to vector<8x256xf32>
    %139 = arith.mulf %137, %138 : vector<8x256xf32>
    %140 = arith.addf %134, %139 : vector<8x256xf32>
    %141 = vector.extract_strided_slice %129 {offsets = [0, 2], sizes = [8, 1], strides = [1, 1]} : vector<8x8xf32> to vector<8x1xf32>
    %142 = vector.extract_strided_slice %128 {offsets = [2, 0], sizes = [1, 256], strides = [1, 1]} : vector<8x256xf32> to vector<1x256xf32>
    %143 = vector.broadcast %141 : vector<8x1xf32> to vector<8x256xf32>
    %144 = vector.broadcast %142 : vector<1x256xf32> to vector<8x256xf32>
    %145 = arith.mulf %143, %144 : vector<8x256xf32>
    %146 = arith.addf %140, %145 : vector<8x256xf32>
    %147 = vector.extract_strided_slice %129 {offsets = [0, 3], sizes = [8, 1], strides = [1, 1]} : vector<8x8xf32> to vector<8x1xf32>
    %148 = vector.extract_strided_slice %128 {offsets = [3, 0], sizes = [1, 256], strides = [1, 1]} : vector<8x256xf32> to vector<1x256xf32>
    %149 = vector.broadcast %147 : vector<8x1xf32> to vector<8x256xf32>
    %150 = vector.broadcast %148 : vector<1x256xf32> to vector<8x256xf32>
    %151 = arith.mulf %149, %150 : vector<8x256xf32>
    %152 = arith.addf %146, %151 : vector<8x256xf32>
    %153 = vector.extract_strided_slice %129 {offsets = [0, 4], sizes = [8, 1], strides = [1, 1]} : vector<8x8xf32> to vector<8x1xf32>
    %154 = vector.extract_strided_slice %128 {offsets = [4, 0], sizes = [1, 256], strides = [1, 1]} : vector<8x256xf32> to vector<1x256xf32>
    %155 = vector.broadcast %153 : vector<8x1xf32> to vector<8x256xf32>
    %156 = vector.broadcast %154 : vector<1x256xf32> to vector<8x256xf32>
    %157 = arith.mulf %155, %156 : vector<8x256xf32>
    %158 = arith.addf %152, %157 : vector<8x256xf32>
    %159 = vector.extract_strided_slice %129 {offsets = [0, 5], sizes = [8, 1], strides = [1, 1]} : vector<8x8xf32> to vector<8x1xf32>
    %160 = vector.extract_strided_slice %128 {offsets = [5, 0], sizes = [1, 256], strides = [1, 1]} : vector<8x256xf32> to vector<1x256xf32>
    %161 = vector.broadcast %159 : vector<8x1xf32> to vector<8x256xf32>
    %162 = vector.broadcast %160 : vector<1x256xf32> to vector<8x256xf32>
    %163 = arith.mulf %161, %162 : vector<8x256xf32>
    %164 = arith.addf %158, %163 : vector<8x256xf32>
    %165 = vector.extract_strided_slice %129 {offsets = [0, 6], sizes = [8, 1], strides = [1, 1]} : vector<8x8xf32> to vector<8x1xf32>
    %166 = vector.extract_strided_slice %128 {offsets = [6, 0], sizes = [1, 256], strides = [1, 1]} : vector<8x256xf32> to vector<1x256xf32>
    %167 = vector.broadcast %165 : vector<8x1xf32> to vector<8x256xf32>
    %168 = vector.broadcast %166 : vector<1x256xf32> to vector<8x256xf32>
    %169 = arith.mulf %167, %168 : vector<8x256xf32>
    %170 = arith.addf %164, %169 : vector<8x256xf32>
    %171 = vector.extract_strided_slice %129 {offsets = [0, 7], sizes = [8, 1], strides = [1, 1]} : vector<8x8xf32> to vector<8x1xf32>
    %172 = vector.extract_strided_slice %128 {offsets = [7, 0], sizes = [1, 256], strides = [1, 1]} : vector<8x256xf32> to vector<1x256xf32>
    %173 = vector.broadcast %171 : vector<8x1xf32> to vector<8x256xf32>
    %174 = vector.broadcast %172 : vector<1x256xf32> to vector<8x256xf32>
    %175 = arith.mulf %173, %174 : vector<8x256xf32>
    %176 = arith.addf %170, %175 : vector<8x256xf32>
    %177 = vector.broadcast %4 : vector<8x1xf32> to vector<8x256xf32>
    %178 = arith.addf %176, %177 : vector<8x256xf32>
    %179 = arith.addf %178, %1 : vector<8x256xf32>
    %c0_24 = arith.constant 0 : index
    %c0_25 = arith.constant 0 : index
    %c0_26 = arith.constant 0 : index
    %180 = vector.load %arg7[%c0_24, %c0_25, %c0_26] : memref<1x8x256xf32, #tpu.memory_space<vmem>>, vector<1x8x256xf32>
    %181 = vector.shape_cast %180 : vector<1x8x256xf32> to vector<8x256xf32>
    %182 = vector.shape_cast %179 : vector<8x256xf32> to vector<1x8x256xf32>
    tpu.vector_store %arg7[%c0_24, %c0_25, %c0_26], %182 {strides = array<i32>} : memref<1x8x256xf32, #tpu.memory_space<vmem>>, vector<1x8x256xf32>,
    return
  }
  func.func @transform_0(%arg0: i32) -> (i32, i32, i32) {
    %c0_i32 = arith.constant 0 : i32
    %c0_i32_0 = arith.constant 0 : i32
    %c0_i32_1 = arith.constant 0 : i32
    return %arg0, %c0_i32, %c0_i32_0 : i32, i32, i32
  }
  func.func @transform_1(%arg0: i32) -> (i32, i32) {
    %c0_i32 = arith.constant 0 : i32
    %c0_i32_0 = arith.constant 0 : i32
    %c0_i32_1 = arith.constant 0 : i32
    return %c0_i32, %c0_i32_0 : i32, i32
  }
  func.func @transform_2(%arg0: i32) -> (i32, i32) {
    %c0_i32 = arith.constant 0 : i32
    %c0_i32_0 = arith.constant 0 : i32
    %c0_i32_1 = arith.constant 0 : i32
    return %c0_i32, %c0_i32_0 : i32, i32
  }
  func.func @transform_3(%arg0: i32) -> (i32, i32) {
    %c0_i32 = arith.constant 0 : i32
    %c0_i32_0 = arith.constant 0 : i32
    %c0_i32_1 = arith.constant 0 : i32
    return %c0_i32, %c0_i32_0 : i32, i32
  }
  func.func @transform_4(%arg0: i32) -> (i32, i32) {
    %c0_i32 = arith.constant 0 : i32
    %c0_i32_0 = arith.constant 0 : i32
    %c0_i32_1 = arith.constant 0 : i32
    return %c0_i32, %c0_i32_0 : i32, i32
  }
  func.func @transform_5(%arg0: i32) -> (i32, i32) {
    %c0_i32 = arith.constant 0 : i32
    %c0_i32_0 = arith.constant 0 : i32
    %c0_i32_1 = arith.constant 0 : i32
    return %c0_i32, %c0_i32_0 : i32, i32
  }
  func.func @transform_6(%arg0: i32) -> (i32, i32, i32) {
    %c0_i32 = arith.constant 0 : i32
    %c0_i32_0 = arith.constant 0 : i32
    %c0_i32_1 = arith.constant 0 : i32
    return %arg0, %c0_i32, %c0_i32_0 : i32, i32, i32
  }
}

</mosaic_0001>

<bundles_post_ra>
// kernel: tpu_custom_call.1
= control target key start
LH: loop header
LB: loop body
LE: loop exit
PB: predicated region body
PF: predicated region fallthrough
CT: control target
= control target key end

     0   :  { %11 = vsyncpa [#allocation3], 0  ;;  %s1045_s0 = inlined_call_operand.hbm [shape: f32[1,8,256], index: 0, kind: input, shape index: {}]   ;;  %s1046_s1 = inlined_call_operand.vmem [shape: f32[8,8], index: 1, kind: input, shape index: {}]   ;;  %s1047_s2 = inlined_call_operand.vmem [shape: f32[8,9], index: 2, kind: input, shape index: {}]   ;;  %s1048_s3 = inlined_call_operand.hbm [shape: f32[8,8], index: 3, kind: input, shape index: {}]   ;;  %s1049_s4 = inlined_call_operand.vmem [shape: f32[8,3], index: 4, kind: input, shape index: {}]   ;;  %s1050_s5 = inlined_call_operand.hbm [shape: f32[9,256], index: 5, kind: input, shape index: {}]   ;;  %s1051_s6 = inlined_call_operand.hbm [shape: f32[1,8,256], index: 6, kind: output, shape index: {}]  }
   0x1   :  { %12 = vsyncpa [#allocation6], 0 }
   0x2   :  { %13 = vsyncpa [#allocation4], 0  ;;  %s756_s21 = smov [#allocation5]   ;;  %s757_s23 = smov [#allocation2]  }
   0x3   :  { %s34_s22 = sshll.u32 %s756_s21, 4  ;;  %s20_s24 = sshll.u32 %s757_s23, 4  ;;  %s35_s22 = int_to_ptr.vmem [resolvable:$true] %s34_s22  ;;  %s21_s24 = int_to_ptr.vmem [resolvable:$true] %s20_s24 }
   0x4   :  { %s662_s27 = scalar_lea.hbm %s1048_s3, 128 }
   0x5   :  { %p663_p0 = scmp.ne.s32.totalorder %s1048_s3, %s662_s27  ;;  %p666_p1 = scmp.lt.u32.totalorder %s662_s27, %s1048_s3 }
   0x7   :  { %p668_p2 = pnand %p666_p1, %p663_p0 }
   0x9   :  { %671 = shalt.err (!%p668_p2)
}
   0xa   :  { %s672_s8 = scalar_lea.vmem %s35_s22, 128  ;;  %p677_p4 = scmp.lt.s32.totalorder %s35_s22, %s35_s22 }
   0xb   :  { %p673_p3 = scmp.ne.s32.totalorder %s35_s22, %s672_s8  ;;  %p678_p5 = scmp.lt.s32.totalorder %s672_s8, %s672_s8 }
   0xd   :  { %p679_p6 = por %p678_p5, %p677_p4 }
   0xf   :  { %p680_p7 = pnand %p679_p6, %p673_p3 }
  0x11   :  { %683 = shalt.err (!%p680_p7)
}
  0x12   :  { %37 = dma.hbm_to_vmem [thread:$0]  %s1048_s3, 128, %s35_s22, [#allocation6]  }
  0x13   :  { %s684_s13 = scalar_lea.hbm %s1045_s0, 256 }
  0x14   :  { %p685_p8 = scmp.ne.s32.totalorder %s1045_s0, %s684_s13  ;;  %p688_p9 = scmp.lt.u32.totalorder %s684_s13, %s1045_s0 }
  0x16   :  { %p690_p10 = pnand %p688_p9, %p685_p8 }
  0x18   :  { %693 = shalt.err (!%p690_p10)
}
  0x19   :  { %s694_s18 = scalar_lea.vmem %s21_s24, 256  ;;  %p699_p12 = scmp.lt.s32.totalorder %s21_s24, %s21_s24 }
  0x1a   :  { %p695_p11 = scmp.ne.s32.totalorder %s21_s24, %s694_s18  ;;  %p700_p13 = scmp.lt.s32.totalorder %s694_s18, %s694_s18 }
  0x1c   :  { %p701_p0 = por %p700_p13, %p699_p12 }
  0x1e   :  { %p702_p1 = pnand %p701_p0, %p695_p11 }
  0x20   :  { %705 = shalt.err (!%p702_p1)
}
  0x21   :  { %23 = dma.hbm_to_vmem [thread:$0]  %s1045_s0, 256, %s21_s24, [#allocation3]  }
  0x22   :  { %s758_s20 = smov [#allocation7]   ;;  %s706_s25 = scalar_lea.hbm %s1050_s5, 512 }
  0x23   :  { %s45_s21 = sshll.u32 %s758_s20, 4  ;;  %p707_p2 = scmp.ne.s32.totalorder %s1050_s5, %s706_s25  ;;  %s46_s21 = int_to_ptr.vmem [resolvable:$true] %s45_s21 }
  0x24   :  { %p710_p3 = scmp.lt.u32.totalorder %s706_s25, %s1050_s5 }
  0x26   :  { %p712_p4 = pnand %p710_p3, %p707_p2 }
  0x28   :  { %715 = shalt.err (!%p712_p4)
}
  0x29   :  { %s716_s30 = scalar_lea.vmem %s46_s21, 512  ;;  %p721_p6 = scmp.lt.s32.totalorder %s46_s21, %s46_s21 }
  0x2a   :  { %p717_p5 = scmp.ne.s32.totalorder %s46_s21, %s716_s30  ;;  %p722_p7 = scmp.lt.s32.totalorder %s716_s30, %s716_s30 }
  0x2c   :  { %p723_p8 = por %p722_p7, %p721_p6 }
  0x2e   :  { %p724_p9 = pnand %p723_p8, %p717_p5 }
  0x30   :  { %727 = shalt.err (!%p724_p9)
}
  0x31   :  { %s759_s0 = smov 256   ;;  %s760_s24 = smov 16  }
  0x32   :  { %51 = dma.hbm_to_vmem [thread:$0]  %s1050_s5, 512, %s46_s21, [#allocation6], %s759_s0, %s759_s0, %s760_s24  }
  0x33   :  { %750 = dma.done.wait [#allocation3], 256  }
  0x34   :  { %751 = vsyncadd [#allocation3], 4294967040 }
  0x35   :  { %752 = dma.done.wait [#allocation6], 640  }
  0x36   :  { %753 = vsyncadd [#allocation6], 4294966656  ;;  %v761_v0 = vmov 2   ;;  %v762_v1 = vmov 0   ;;  %v64_v2 = vld [vmem:[%s1046_s1] sm:$0xff]  ;;  %v763_v3 = vmov 3   ;;  %v70_v12 = vlaneseq }
  0x37   :  { %636 = vset.pattern.permute.xlu1 %v761_v0  ;;  %634 = vset.pattern.permute.xlu0 %v762_v1  ;;  %v764_v4 = vmov 1   ;;  %v765_v5 = vmov 4   ;;  %v766_v6 = vmov 5   ;;  %v861_v7 = vld [vmem:[%s1049_s4] sm:$0xff]  ;;  %v767_v8 = vmov 6   ;;  %v886_v20 = vld [vmem:[#allocation2 + $0x8] sm:$0xff] }
  0x38   :  { %97 = vperm.xlu1 %636, %v64_v2   ;;  %67 = vperm.xlu0 %634, %v64_v2   ;;  %v768_v9 = vmov 7   ;;  %v201_v10 = vld [vmem:[%s1047_s2] sm:$0xff]  ;;  %v769_v11 = vmov 8   ;;  %v71_v13 = vshrl.u32 %v70_v12, 7  ;;  %s770_s2 = smov 17   ;;  %s771_s4 = smov 1  }
  0x39   :  { %v884_v19 = vld [vmem:[#allocation2] sm:$0xff]  ;;  %s772_s13 = smov 113   ;;  %s773_s14 = smov 112  }
  0x3a   :  { %v878_v14 = vsub.s32 0, %v71_v13  ;;  %v880_v15 = vsub.s32 1, %v71_v13  ;;  %v882_v16 = vsub.s32 2, %v71_v13  ;;  %v888_v21 = vsub.s32 3, %v71_v13  ;;  %s774_s15 = smov 15   ;;  %s775_s16 = smov 127  }
  0x3b   :  { %v898_v26 = vsub.s32 4, %v71_v13  ;;  %v908_v33 = vsub.s32 5, %v71_v13  ;;  %v918_v46 = vsub.s32 6, %v71_v13  ;;  %v920_v57 = vsub.s32 7, %v71_v13  ;;  %s776_s17 = smov 111   ;;  %s777_s18 = smov [#allocation8]  }
  0x3c   :  { %637 = vset.pattern.permute.xlu1 %v763_v3  ;;  %635 = vset.pattern.permute.xlu0 %v764_v4  ;;  %v73_v22 = vrot.slane %v884_v19, %v878_v14  ;;  %v77_v23 = vrot.slane %v886_v20, %v878_v14  ;;  %v87_v24 = vrot.slane %v884_v19, %v880_v15  ;;  %s602_s3 = sshll.u32 %s777_s18, 4  ;;  %s603_s3 = int_to_ptr.vmem [resolvable:$true] %s602_s3 }
  0x3d   :  { %113 = vperm.xlu1 %637, %v64_v2   ;;  %81 = vperm.xlu0 %635, %v64_v2   ;;  %v91_v25 = vrot.slane %v886_v20, %v880_v15  ;;  %v103_v27 = vrot.slane %v884_v19, %v882_v16  ;;  %v107_v28 = vrot.slane %v886_v20, %v882_v16  ;;  %s728_s19 = scalar_lea.vmem %s603_s3, 256  ;;  %p733_p11 = scmp.lt.s32.totalorder %s603_s3, %s603_s3 }
  0x3e   :  { %v119_v30 = vrot.slane %v884_v19, %v888_v21  ;;  %v123_v31 = vrot.slane %v886_v20, %v888_v21  ;;  %v135_v38 = vrot.slane %v884_v19, %v898_v26  ;;  %v139_v39 = vrot.slane %v886_v20, %v898_v26  ;;  %p729_p10 = scmp.ne.s32.totalorder %s603_s3, %s728_s19  ;;  %p734_p12 = scmp.lt.s32.totalorder %s728_s19, %s728_s19 }
  0x3f   :  { %v151_v44 = vrot.slane %v884_v19, %v908_v33  ;;  %v155_v45 = vrot.slane %v886_v20, %v908_v33  ;;  %v167_v60 = vrot.slane %v884_v19, %v918_v46  ;;  %v171_v61 = vrot.slane %v886_v20, %v918_v46 }
  0x40   :  { %p735_p13 = por %p734_p12, %p733_p11 }
  0x41   :  { %638 = vset.pattern.permute.xlu1 %v765_v5  ;;  %639 = vset.pattern.permute.xlu0 %v766_v6 }
  0x42   :  { %129 = vperm.xlu1 %638, %v64_v2   ;;  %145 = vperm.xlu0 %639, %v64_v2   ;;  %p736_p0 = pnand %p735_p13, %p729_p10 }
  0x46   :  { %640 = vset.pattern.permute.xlu1 %v767_v8  ;;  %642 = vset.pattern.permute.xlu0 %v762_v1 }
  0x47   :  { %161 = vperm.xlu1 %640, %v64_v2   ;;  %194 = vperm.xlu0 %642, %v861_v7  }
  0x4b   :  { %641 = vset.pattern.permute.xlu1 %v768_v9  ;;  %645 = vset.pattern.permute.xlu0 %v767_v8 }
  0x4c   :  { %177 = vperm.xlu1 %641, %v64_v2   ;;  %270 = vperm.xlu0 %645, %v201_v10   ;;  %v183_v2 = vrot.slane %v884_v19, %v920_v57 }
  0x50   :  { %643 = vset.pattern.permute.xlu1 %v762_v1  ;;  %648 = vset.pattern.permute.xlu0 %v768_v9 }
  0x51   :  { %213 = vperm.xlu1 %643, %v201_v10   ;;  %338 = vperm.xlu0 %648, %v201_v10  }
  0x55   :  { %644 = vset.pattern.permute.xlu1 %v763_v3  ;;  %649 = vset.pattern.permute.xlu0 %v761_v0 }
  0x56   :  { %240 = vperm.xlu1 %644, %v201_v10   ;;  %368 = vperm.xlu0 %649, %v201_v10  }
  0x5a   :  { %646 = vset.pattern.permute.xlu1 %v764_v4  ;;  %652 = vset.pattern.permute.xlu0 %v764_v4 }
  0x5b   :  { %300 = vperm.xlu1 %646, %v201_v10  }
  0x5f   :  { %647 = vset.pattern.permute.xlu1 %v765_v5 }
  0x60   :  { %323 = vperm.xlu1 %647, %v201_v10  }
  0x64   :  { %650 = vset.pattern.permute.xlu1 %v766_v6 }
  0x65   :  { %398 = vperm.xlu1 %650, %v201_v10  }
  0x69   :  { %651 = vset.pattern.permute.xlu1 %v769_v11 }
  0x6a   :  { %428 = vperm.xlu1 %651, %v201_v10   ;;  %v187_v10 = vrot.slane %v886_v20, %v920_v57 }
  0x6e   :  { %653 = vset.pattern.permute.xlu1 %v762_v1 }
  0xb7   :  { %v98_v17 = vpop.permute.xlu1 %97  ;;  %v68_v18 = vpop.permute.xlu0 %67 }
  0xb8   :  { %v78_v34 = vmul.f32 %v73_v22, %v68_v18  ;;  %v79_v35 = vmul.f32 %v77_v23, %v68_v18  ;;  %v108_v40 = vmul.f32 %v103_v27, %v98_v17  ;;  %v109_v41 = vmul.f32 %v107_v28, %v98_v17 }
  0xbc   :  { %v114_v29 = vpop.permute.xlu1 %113  ;;  %v82_v32 = vpop.permute.xlu0 %81 }
  0xbd   :  { %v92_v36 = vmul.f32 %v87_v24, %v82_v32  ;;  %v93_v37 = vmul.f32 %v91_v25, %v82_v32  ;;  %v124_v47 = vmul.f32 %v119_v30, %v114_v29  ;;  %v125_v48 = vmul.f32 %v123_v31, %v114_v29 }
  0xbf   :  { %v94_v42 = vadd.f32 %v92_v36, %v78_v34  ;;  %v95_v43 = vadd.f32 %v93_v37, %v79_v35  ;;  %v458_v36 = vld [vmem:[#allocation5] sm:$0xff] }
  0xc1   :  { %v110_v49 = vadd.f32 %v108_v40, %v94_v42  ;;  %v111_v50 = vadd.f32 %v109_v41, %v95_v43  ;;  %v130_v51 = vpop.permute.xlu1 %129  ;;  %v146_v52 = vpop.permute.xlu0 %145 }
  0xc2   :  { %v140_v53 = vmul.f32 %v135_v38, %v130_v51  ;;  %v141_v54 = vmul.f32 %v139_v39, %v130_v51  ;;  %v156_v58 = vmul.f32 %v151_v44, %v146_v52  ;;  %v157_v59 = vmul.f32 %v155_v45, %v146_v52 }
  0xc3   :  { %v126_v55 = vadd.f32 %v124_v47, %v110_v49  ;;  %v127_v56 = vadd.f32 %v125_v48, %v111_v50  ;;  %v973_v44 = vand.u32 127, %v70_v12  ;;  %v218_v47 = vld [vmem:[#allocation7] ss:$8 sm:$0x3] }
  0xc4   :  { %v246_v49 = vld [vmem:[#allocation7 + $0x3] ss:$8 sm:$0x3]  ;;  %v223_v52 = vrot.slane %v218_v47, %v878_v14 }
  0xc5   :  { %v142_v62 = vadd.f32 %v140_v53, %v126_v55  ;;  %v143_v63 = vadd.f32 %v141_v54, %v127_v56  ;;  %vm236_vm0 = vcmp.lt.s32.totalorder %v973_v44, 1  ;;  %vm208_vm1 = vcmp.lt.s32.totalorder %v973_v44, 17  ;;  %v276_v54 = vld [vmem:[#allocation7 + $0x6] ss:$8 sm:$0x3] }
  0xc6   :  { %v162_v1 = vpop.permute.xlu1 %161  ;;  %v195_v28 = vpop.permute.xlu0 %194  ;;  %vm266_vm2 = vcmp.lt.s32.totalorder %v973_v44, 113  ;;  %v227_v53 = vrot.slane %v218_v47, %v880_v15  ;;  %vm296_vm3 = vcmp.lt.s32.totalorder %v973_v44, 16  ;;  %vm334_vm4 = vcmp.lt.s32.totalorder %v973_v44, 112  ;;  %v344_v47 = vld [vmem:[#allocation7 + $0x7] ss:$8 sm:$0x3] }
  0xc7   :  { %v158_v11 = vadd.f32 %v156_v58, %v142_v62  ;;  %v159_v13 = vadd.f32 %v157_v59, %v143_v63  ;;  %v172_v17 = vmul.f32 %v167_v60, %v162_v1  ;;  %v173_v18 = vmul.f32 %v171_v61, %v162_v1  ;;  %v306_v1 = vld [vmem:[#allocation7 + $0x1] ss:$8 sm:$0x3] }
  0xc8   :  { %v251_v60 = vrot.slane %v246_v49, %v878_v14  ;;  %v255_v61 = vrot.slane %v246_v49, %v880_v15  ;;  %vm364_vm5 = vcmp.lt.s32.totalorder %v973_v44, 15  ;;  %vm394_vm6 = vcmp.lt.s32.totalorder %v973_v44, 127 }
  0xc9   :  { %v174_v23 = vadd.f32 %v172_v17, %v158_v11  ;;  %v175_v24 = vadd.f32 %v173_v18, %v159_v13  ;;  %vm424_vm7 = vcmp.lt.s32.totalorder %v973_v44, 111 }
  0xcb   :  { %v178_v22 = vpop.permute.xlu1 %177 }
  0xcc   :  { %v188_v25 = vmul.f32 %v183_v2, %v178_v22  ;;  %v189_v27 = vmul.f32 %v187_v10, %v178_v22  ;;  %v281_v2 = vrot.slane %v276_v54, %v878_v14  ;;  %v285_v10 = vrot.slane %v276_v54, %v880_v15 }
  0xce   :  { %v190_v29 = vadd.f32 %v188_v25, %v174_v23  ;;  %v191_v30 = vadd.f32 %v189_v27, %v175_v24  ;;  %v311_v25 = vrot.slane %v306_v1, %v878_v14  ;;  %v315_v27 = vrot.slane %v306_v1, %v880_v15 }
  0xd0   :  { %v197_v31 = vadd.f32 %v195_v28, %v190_v29  ;;  %v198_v32 = vadd.f32 %v195_v28, %v191_v30 }
  0xd2   :  { %v930_v34 = vmax.f32 %v197_v31, 0.0  ;;  %v932_v35 = vmax.f32 %v198_v32, 0.0 }
  0xd4   :  { %204 = vrot.lane.b32.xlu0 %v932_v35, %s770_s2  ;;  %202 = vrot.lane.b32.xlu1 %v930_v34, %s770_s2 }
  0xd8   :  { %234 = vrot.lane.b32.xlu0 %v932_v35, %s771_s4  ;;  %232 = vrot.lane.b32.xlu1 %v930_v34, %s771_s4 }
  0xdc   :  { %264 = vrot.lane.b32.xlu0 %v932_v35, %s772_s13  ;;  %262 = vrot.lane.b32.xlu1 %v930_v34, %s772_s13 }
  0xe0   :  { %332 = vrot.lane.b32.xlu0 %v932_v35, %s773_s14  ;;  %292 = vrot.lane.b32.xlu1 %v930_v34, %s760_s24 }
  0xe4   :  { %360 = vrot.lane.b32.xlu0 %v930_v34, %s774_s15  ;;  %294 = vrot.lane.b32.xlu1 %v932_v35, %s760_s24 }
  0xe8   :  { %390 = vrot.lane.b32.xlu0 %v930_v34, %s775_s16  ;;  %330 = vrot.lane.b32.xlu1 %v930_v34, %s773_s14 }
  0xec   :  { %420 = vrot.lane.b32.xlu0 %v930_v34, %s776_s17  ;;  %362 = vrot.lane.b32.xlu1 %v932_v35, %s774_s15 }
  0xf0   :  { %392 = vrot.lane.b32.xlu1 %v932_v35, %s775_s16  ;;  %451 = vperm.xlu0 %652, %v861_v7  }
  0xf4   :  { %461 = vperm.xlu1 %653, %v458_v36   ;;  %655 = vset.pattern.permute.xlu0 %v761_v0 }
  0xf5   :  { %491 = vperm.xlu0 %655, %v458_v36  }
  0xf8   :  { %422 = vrot.lane.b32.xlu1 %v932_v35, %s776_s17 }
  0xf9   :  { %654 = vset.pattern.permute.xlu1 %v764_v4  ;;  %658 = vset.pattern.permute.xlu0 %v766_v6  ;;  %v214_v4 = vpop.permute.xlu1 %213 }
  0xfa   :  { %539 = vperm.xlu0 %658, %v458_v36  }
  0xfc   :  { %475 = vperm.xlu1 %654, %v458_v36  }
  0xfd   :  { %v241_v6 = vpop.permute.xlu1 %240 }
  0xfe   :  { %661 = vset.pattern.permute.xlu0 %v761_v0 }
  0xff   :  { %587 = vperm.xlu0 %661, %v861_v7   ;;  %v271_v7 = vpop.permute.xlu0 %270 }
 0x100   :  { %656 = vset.pattern.permute.xlu1 %v763_v3 }
 0x101   :  { %507 = vperm.xlu1 %656, %v458_v36   ;;  %v301_v37 = vpop.permute.xlu1 %300 }
 0x103   :  { %v968_v3 = vpop.permute.xlu0 %338 }
 0x105   :  { %657 = vset.pattern.permute.xlu1 %v765_v5  ;;  %v962_v38 = vpop.permute.xlu1 %323 }
 0x106   :  { %523 = vperm.xlu1 %657, %v458_v36  }
 0x107   :  { %v970_v41 = vpop.permute.xlu0 %368 }
 0x109   :  { %v964_v0 = vpop.permute.xlu1 %398 }
 0x10a   :  { %659 = vset.pattern.permute.xlu1 %v767_v8 }
 0x10b   :  { %555 = vperm.xlu1 %659, %v458_v36  }
 0x10d   :  { %v966_v39 = vpop.permute.xlu1 %428 }
 0x10f   :  { %660 = vset.pattern.permute.xlu1 %v768_v9 }
 0x110   :  { %571 = vperm.xlu1 %660, %v458_v36  }
 0x146   :  { %v203_v5 = vpop.permute.xlu1 %202  ;;  %v205_v42 = vpop.permute.xlu0 %204 }
 0x147   :  { %v209_v12 = vsel %vm208_vm1, %v203_v5, %v205_v42  ;;  %v210_v55 = vsel %vm208_vm1, %v205_v42, %v203_v5 }
 0x148   :  { %v216_v18 = vmul.f32 %v214_v4, %v210_v55  ;;  %v217_v22 = vmul.f32 %v214_v4, %v209_v12  ;;  %v349_v55 = vrot.slane %v344_v47, %v878_v14 }
 0x14a   :  { %v233_v40 = vpop.permute.xlu1 %232  ;;  %v235_v43 = vpop.permute.xlu0 %234  ;;  %v230_v36 = vmul.f32 %v223_v52, %v216_v18  ;;  %v374_v52 = vld [vmem:[#allocation7 + $0x2] ss:$8 sm:$0x3] }
 0x14b   :  { %v237_v50 = vsel %vm236_vm0, %v233_v40, %v235_v43  ;;  %v238_v51 = vsel %vm236_vm0, %v235_v43, %v233_v40 }
 0x14c   :  { %v243_v62 = vmul.f32 %v241_v6, %v238_v51  ;;  %v244_v63 = vmul.f32 %v241_v6, %v237_v50  ;;  %v231_v6 = vmul.f32 %v227_v53, %v217_v22 }
 0x14e   :  { %v263_v8 = vpop.permute.xlu1 %262  ;;  %v265_v48 = vpop.permute.xlu0 %264  ;;  %v258_v28 = vmul.f32 %v251_v60, %v243_v62  ;;  %v259_v29 = vmul.f32 %v255_v61, %v244_v63  ;;  %v404_v61 = vld [vmem:[#allocation7 + $0x5] ss:$8 sm:$0x3]  ;;  %v327_v62 = vmul.f32 %v962_v38, %v932_v35 }
 0x14f   :  { %v267_v56 = vsel %vm266_vm2, %v263_v8, %v265_v48  ;;  %v268_v58 = vsel %vm266_vm2, %v265_v48, %v263_v8  ;;  %v413_v35 = vrot.slane %v404_v61, %v880_v15 }
 0x150   :  { %v273_v23 = vmul.f32 %v271_v7, %v267_v56  ;;  %v274_v24 = vmul.f32 %v271_v7, %v268_v58  ;;  %v260_v42 = vadd.f32 %v258_v28, %v230_v36  ;;  %v261_v4 = vadd.f32 %v259_v29, %v231_v6 }
 0x151   :  { %v353_v56 = vrot.slane %v344_v47, %v880_v15 }
 0x152   :  { %v293_v9 = vpop.permute.xlu1 %292  ;;  %v333_v11 = vpop.permute.xlu0 %332  ;;  %v288_v5 = vmul.f32 %v281_v2, %v273_v23  ;;  %v289_v40 = vmul.f32 %v285_v10, %v274_v24  ;;  %v379_v2 = vrot.slane %v374_v52, %v878_v14  ;;  %v383_v10 = vrot.slane %v374_v52, %v880_v15 }
 0x154   :  { %v290_v43 = vadd.f32 %v288_v5, %v260_v42 }
 0x156   :  { %v295_v45 = vpop.permute.xlu1 %294  ;;  %v361_v8 = vpop.permute.xlu0 %360 }
 0x157   :  { %v297_v13 = vsel %vm296_vm3, %v293_v9, %v295_v45  ;;  %v298_v17 = vsel %vm296_vm3, %v295_v45, %v293_v9  ;;  %v291_v45 = vadd.f32 %v289_v40, %v261_v4 }
 0x158   :  { %v303_v30 = vmul.f32 %v301_v37, %v298_v17  ;;  %v304_v31 = vmul.f32 %v301_v37, %v297_v13 }
 0x15a   :  { %v331_v59 = vpop.permute.xlu1 %330  ;;  %v318_v9 = vmul.f32 %v311_v25, %v303_v30  ;;  %v319_v7 = vmul.f32 %v315_v27, %v304_v31  ;;  %v391_v12 = vpop.permute.xlu0 %390  ;;  %v434_v25 = vld [vmem:[#allocation7 + $0x10] ss:$8 sm:$0x3] }
 0x15b   :  { %v335_v48 = vsel %vm334_vm4, %v331_v59, %v333_v11  ;;  %v336_v49 = vsel %vm334_vm4, %v333_v11, %v331_v59  ;;  %v326_v59 = vmul.f32 %v962_v38, %v930_v34  ;;  %v409_v34 = vrot.slane %v404_v61, %v878_v14 }
 0x15c   :  { %v320_v50 = vadd.f32 %v318_v9, %v290_v43  ;;  %v321_v51 = vadd.f32 %v319_v7, %v291_v45  ;;  %v341_v58 = vmul.f32 %v968_v3, %v335_v48  ;;  %v342_v60 = vmul.f32 %v968_v3, %v336_v49 }
 0x15d   :  { %v443_v29 = vrot.slane %v434_v25, %v880_v15 }
 0x15e   :  { %v363_v32 = vpop.permute.xlu1 %362  ;;  %v329_v13 = vadd.f32 %v327_v62, %v321_v51  ;;  %v328_v17 = vadd.f32 %v326_v59, %v320_v50  ;;  %v356_v38 = vmul.f32 %v349_v55, %v341_v58  ;;  %v357_v18 = vmul.f32 %v353_v56, %v342_v60 }
 0x15f   :  { %v365_v53 = vsel %vm364_vm5, %v361_v8, %v363_v32  ;;  %v366_v54 = vsel %vm364_vm5, %v363_v32, %v361_v8  ;;  %v421_v32 = vpop.permute.xlu0 %420 }
 0x160   :  { %v371_v11 = vmul.f32 %v970_v41, %v366_v54  ;;  %v372_v3 = vmul.f32 %v970_v41, %v365_v53  ;;  %v439_v41 = vrot.slane %v434_v25, %v878_v14  ;;  %v358_v30 = vadd.f32 %v356_v38, %v328_v17 }
 0x161   :  { %v359_v31 = vadd.f32 %v357_v18, %v329_v13 }
 0x162   :  { %v393_v37 = vpop.permute.xlu1 %392  ;;  %v386_v27 = vmul.f32 %v379_v2, %v371_v11  ;;  %v387_v28 = vmul.f32 %v383_v10, %v372_v3 }
 0x163   :  { %v395_v63 = vsel %vm394_vm6, %v391_v12, %v393_v37  ;;  %v396_v1 = vsel %vm394_vm6, %v393_v37, %v391_v12 }
 0x164   :  { %v401_v22 = vmul.f32 %v964_v0, %v395_v63  ;;  %v402_v23 = vmul.f32 %v964_v0, %v396_v1  ;;  %v388_v42 = vadd.f32 %v386_v27, %v358_v30  ;;  %v389_v0 = vadd.f32 %v387_v28, %v359_v31 }
 0x166   :  { %v416_v36 = vmul.f32 %v409_v34, %v401_v22  ;;  %v417_v6 = vmul.f32 %v413_v35, %v402_v23 }
 0x168   :  { %v418_v43 = vadd.f32 %v416_v36, %v388_v42  ;;  %v419_v45 = vadd.f32 %v417_v6, %v389_v0 }
 0x16f   :  { %v452_v37 = vpop.permute.xlu0 %451 }
 0x173   :  { %v462_v24 = vpop.permute.xlu1 %461 }
 0x174   :  { %v492_v58 = vpop.permute.xlu0 %491 }
 0x177   :  { %v423_v5 = vpop.permute.xlu1 %422 }
 0x178   :  { %v425_v40 = vsel %vm424_vm7, %v421_v32, %v423_v5  ;;  %v426_v8 = vsel %vm424_vm7, %v423_v5, %v421_v32 }
 0x179   :  { %v431_v4 = vmul.f32 %v966_v39, %v425_v40  ;;  %v432_v9 = vmul.f32 %v966_v39, %v426_v8  ;;  %v540_v23 = vpop.permute.xlu0 %539 }
 0x17b   :  { %v446_v7 = vmul.f32 %v439_v41, %v431_v4  ;;  %v447_v44 = vmul.f32 %v443_v29, %v432_v9  ;;  %v476_v47 = vpop.permute.xlu1 %475 }
 0x17d   :  { %v448_v48 = vadd.f32 %v446_v7, %v418_v43  ;;  %v449_v49 = vadd.f32 %v447_v44, %v419_v45 }
 0x17e   :  { %v588_v43 = vpop.permute.xlu0 %587 }
 0x17f   :  { %v454_v50 = vadd.f32 %v452_v37, %v448_v48  ;;  %v455_v51 = vadd.f32 %v452_v37, %v449_v49 }
 0x180   :  { %v508_v52 = vpop.permute.xlu1 %507 }
 0x181   :  { %v456_v53 = vmax.f32 %v454_v50, 0.0  ;;  %v457_v54 = vmax.f32 %v455_v51, 0.0 }
 0x183   :  { %v471_v12 = vrot.slane %v457_v54, %v878_v14  ;;  %v485_v55 = vrot.slane %v457_v54, %v880_v15  ;;  %v467_v56 = vrot.slane %v456_v53, %v878_v14  ;;  %v481_v39 = vrot.slane %v456_v53, %v880_v15 }
 0x184   :  { %v497_v60 = vrot.slane %v456_v53, %v882_v16  ;;  %v501_v61 = vrot.slane %v457_v54, %v882_v16  ;;  %v517_v59 = vrot.slane %v457_v54, %v888_v21  ;;  %v513_v62 = vrot.slane %v456_v53, %v888_v21 }
 0x185   :  { %v473_v63 = vmul.f32 %v471_v12, %v462_v24  ;;  %v472_v1 = vmul.f32 %v467_v56, %v462_v24  ;;  %v486_v2 = vmul.f32 %v481_v39, %v476_v47  ;;  %v487_v10 = vmul.f32 %v485_v55, %v476_v47  ;;  %v524_v11 = vpop.permute.xlu1 %523 }
 0x186   :  { %v502_v17 = vmul.f32 %v497_v60, %v492_v58  ;;  %v503_v14 = vmul.f32 %v501_v61, %v492_v58  ;;  %v518_v34 = vmul.f32 %v513_v62, %v508_v52  ;;  %v519_v15 = vmul.f32 %v517_v59, %v508_v52 }
 0x187   :  { %v488_v3 = vadd.f32 %v486_v2, %v472_v1  ;;  %v489_v13 = vadd.f32 %v487_v10, %v473_v63  ;;  %v533_v35 = vrot.slane %v457_v54, %v898_v26  ;;  %v529_v38 = vrot.slane %v456_v53, %v898_v26 }
 0x188   :  { %v545_v22 = vrot.slane %v456_v53, %v908_v33  ;;  %v549_v21 = vrot.slane %v457_v54, %v908_v33  ;;  %v565_v29 = vrot.slane %v457_v54, %v918_v46  ;;  %v561_v30 = vrot.slane %v456_v53, %v918_v46 }
 0x189   :  { %v504_v16 = vadd.f32 %v502_v17, %v488_v3  ;;  %v505_v18 = vadd.f32 %v503_v14, %v489_v13  ;;  %v534_v28 = vmul.f32 %v529_v38, %v524_v11  ;;  %v535_v41 = vmul.f32 %v533_v35, %v524_v11 }
 0x18a   :  { %v556_v24 = vpop.permute.xlu1 %555  ;;  %v550_v31 = vmul.f32 %v545_v22, %v540_v23  ;;  %v551_v32 = vmul.f32 %v549_v21, %v540_v23  ;;  %v581_v6 = vrot.slane %v457_v54, %v920_v57  ;;  %v577_v5 = vrot.slane %v456_v53, %v920_v57 }
 0x18b   :  { %v520_v25 = vadd.f32 %v518_v34, %v504_v16  ;;  %v521_v27 = vadd.f32 %v519_v15, %v505_v18  ;;  %v566_v8 = vmul.f32 %v561_v30, %v556_v24  ;;  %v567_v42 = vmul.f32 %v565_v29, %v556_v24 }
 0x18d   :  { %v536_v36 = vadd.f32 %v534_v28, %v520_v25  ;;  %v537_v26 = vadd.f32 %v535_v41, %v521_v27 }
 0x18f   :  { %v553_v40 = vadd.f32 %v551_v32, %v537_v26  ;;  %v552_v33 = vadd.f32 %v550_v31, %v536_v36  ;;  %v572_v0 = vpop.permute.xlu1 %571 }
 0x190   :  { %v582_v4 = vmul.f32 %v577_v5, %v572_v0  ;;  %v583_v9 = vmul.f32 %v581_v6, %v572_v0 }
 0x191   :  { %v568_v7 = vadd.f32 %v566_v8, %v552_v33  ;;  %v569_v44 = vadd.f32 %v567_v42, %v553_v40 }
 0x193   :  { %v584_v45 = vadd.f32 %v582_v4, %v568_v7  ;;  %v585_v46 = vadd.f32 %v583_v9, %v569_v44 }
 0x195   :  { %v590_v47 = vadd.f32 %v588_v43, %v584_v45  ;;  %v591_v48 = vadd.f32 %v588_v43, %v585_v46 }
 0x197   :  { %v592_v49 = vadd.f32 %v590_v47, %v884_v19  ;;  %v593_v57 = vadd.f32 %v591_v48, %v886_v20 }
 0x199   :  { %594 = vst [vmem:[#allocation8] sm:$0xff] %v592_v49  ;;  %595 = vst [vmem:[#allocation8 + $0x8] sm:$0xff] %v593_v57 }
 0x19a   :  { %739 = shalt.err (!%p736_p0)
}
 0x19b   :  { %s740_s22 = scalar_lea.hbm %s1051_s6, 256 }
 0x19c   :  { %p741_p1 = scmp.ne.s32.totalorder %s1051_s6, %s740_s22  ;;  %p744_p2 = scmp.lt.u32.totalorder %s740_s22, %s1051_s6 }
 0x19e   :  { %p746_p3 = pnand %p744_p2, %p741_p1 }
 0x1a0   :  { %749 = shalt.err (!%p746_p3)
}
 0x1a1   :  { %605 = dma.vmem_to_hbm [thread:$0]  %s603_s3, 256, %s1051_s6, [#allocation4]  }
 0x1a2   :  { %754 = dma.done.wait [#allocation4], 256  }
 0x1a3   :  { %755 = vsyncadd [#allocation4], 4294967040 }
 0x1a4   :  { %609 = vsyncpa [#allocation3], 1 }
 0x1a5   :  { %610 = vsyncpa [#allocation6], 1 }
 0x1a6   :  { %611 = vsyncpa [#allocation4], 1 }

</bundles_post_ra>
